<compile_context>
chip_gen: v6e
topology: v6e:2x2x1
jax: 0.10.0
libtpu: 0.0.40
codegen_flags: <defaults>
</compile_context>

<pallas_src>
import jax
import jax.numpy as jnp
from jax.experimental import pallas as pl
from jax.experimental.pallas import tpu as pltpu

IN_FEATURES = 13
HIDDEN = 26
OUT_FEATURES = 13

MAX_TILE_B = 4096  # batch-tile (sublane) rows per grid step; multiple of 8


def _testnet_kernel(x_ref, w1_ref, b1_ref, w2_ref, b2_ref, o_ref):
    # Natural batch-major layout: batch on sublanes, features on lanes.
    x = x_ref[...]                                                    # (TB, 13) f32
    w1 = w1_ref[...]                                                  # (13, 26)
    w2 = w2_ref[...]                                                  # (26, 13)

    h = jnp.dot(x, w1, preferred_element_type=jnp.float32) + b1_ref[...]   # (TB, 26)
    h = jnp.maximum(h, 0.0)                                                # ReLU
    y = jnp.dot(h, w2, preferred_element_type=jnp.float32) + b2_ref[...]   # (TB, 13)
    o_ref[...] = jnp.tanh(y)                                               # Tanh


def _round_up(n, m):
    return ((n + m - 1) // m) * m


@jax.jit
def testnet_forward(x, w1, b1, w2, b2):
    """x: (B, 13) f32; w1: (13, 26); b1: (26,); w2: (26, 13); b2: (13,) -> (B, 13) f32."""
    B = x.shape[0]

    # Pick the number of batch tiles first, then size tiles evenly (multiple of 8
    # sublanes) so padding waste is at most 7 rows.
    grid_b = pl.cdiv(B, MAX_TILE_B)
    tile_b = _round_up(-(-B // grid_b), 8)
    b_pad = tile_b * grid_b

    if b_pad != B:
        # Cheap, contiguous row padding; padded rows compute garbage that is sliced off.
        x = jnp.pad(x, ((0, b_pad - B), (0, 0)))

    b1r = b1.reshape(1, HIDDEN)        # (1, 26) broadcasts along sublanes
    b2r = b2.reshape(1, OUT_FEATURES)  # (1, 13)

    out = pl.pallas_call(
        _testnet_kernel,
        out_shape=jax.ShapeDtypeStruct((b_pad, OUT_FEATURES), jnp.float32),
        grid_spec=pltpu.PrefetchScalarGridSpec(
            num_scalar_prefetch=0,
            grid=(grid_b,),
            in_specs=[
                # x tile marches along the batch (sublane) axis -> pipelined DMA.
                pl.BlockSpec((tile_b, IN_FEATURES), lambda i: (i, 0)),
                # Weights / biases: constant block index -> resident in VMEM,
                # fetched once, reused for every batch tile.
                pl.BlockSpec((IN_FEATURES, HIDDEN), lambda i: (0, 0)),
                pl.BlockSpec((1, HIDDEN), lambda i: (0, 0)),
                pl.BlockSpec((HIDDEN, OUT_FEATURES), lambda i: (0, 0)),
                pl.BlockSpec((1, OUT_FEATURES), lambda i: (0, 0)),
            ],
            out_specs=pl.BlockSpec((tile_b, OUT_FEATURES), lambda i: (i, 0)),
        ),
        compiler_params=pltpu.CompilerParams(
            # Batch tiles are independent -> shard across the 2 TCs on v7x.
            dimension_semantics=("parallel",),
        ),
    )(x, w1, b1r, w2, b2r)

    return out[:B] if b_pad != B else out


def init_params(key):
    """Deterministic init mimicking nn.Linear's uniform(-1/sqrt(fan_in), 1/sqrt(fan_in))."""
    k1, k2, k3, k4 = jax.random.split(key, 4)
    bound1 = 1.0 / jnp.sqrt(jnp.float32(IN_FEATURES))
    bound2 = 1.0 / jnp.sqrt(jnp.float32(HIDDEN))
    # Stored as (in, out) — transpose of PyTorch's (out, in) weight layout.
    w1 = jax.random.uniform(k1, (IN_FEATURES, HIDDEN), jnp.float32, -bound1, bound1)
    b1 = jax.random.uniform(k2, (HIDDEN,), jnp.float32, -bound1, bound1)
    w2 = jax.random.uniform(k3, (HIDDEN, OUT_FEATURES), jnp.float32, -bound2, bound2)
    b2 = jax.random.uniform(k4, (OUT_FEATURES,), jnp.float32, -bound2, bound2)
    return w1, b1, w2, b2


def _reference(x, w1, b1, w2, b2):
    return jnp.tanh(jnp.maximum(x @ w1 + b1, 0.0) @ w2 + b2)


if __name__ == "__main__":
    key = jax.random.PRNGKey(0)
    kx, kp, kb = jax.random.split(key, 3)
    w1, b1, w2, b2 = init_params(kp)

    # Small-batch case (single tile, one grid step) — the control-loop regime.
    batch = 8
    x = jax.random.normal(kx, (batch, IN_FEATURES), jnp.float32)
    out = testnet_forward(x, w1, b1, w2, b2)
    jax.block_until_ready(out)
    assert out.shape == (batch, OUT_FEATURES)
    assert jnp.allclose(out, _reference(x, w1, b1, w2, b2), atol=1e-5, rtol=1e-5)

    # Larger batch: exercises multi-tile grid (2 tiles) + batch padding (5000 -> 5008).
    big_batch = 5000
    xb = jax.random.normal(kb, (big_batch, IN_FEATURES), jnp.float32)
    outb = testnet_forward(xb, w1, b1, w2, b2)
    jax.block_until_ready(outb)
    assert outb.shape == (big_batch, OUT_FEATURES)
    assert jnp.allclose(outb, _reference(xb, w1, b1, w2, b2), atol=1e-5, rtol=1e-5)

    print("KERNEL_OK")
</pallas_src>

<mosaic_0001>
module attributes {stable_mosaic.version = 11 : i64} {
  func.func @_testnet_kernel(%arg0: i32, %arg1: memref<8x13xf32, #tpu.memory_space<vmem>>, %arg2: memref<13x26xf32, #tpu.memory_space<vmem>>, %arg3: memref<1x26xf32, #tpu.memory_space<vmem>>, %arg4: memref<26x13xf32, #tpu.memory_space<vmem>>, %arg5: memref<1x13xf32, #tpu.memory_space<vmem>>, %arg6: memref<8x13xf32, #tpu.memory_space<vmem>>) attributes {dimension_semantics = [#tpu.dimension_semantics<parallel>], iteration_bounds = array<i64: 1>, scalar_prefetch = 0 : i64, scratch_operands = 0 : i64, tpu.core_type = #tpu.core_type<tc>, window_params = [{transform_indices = @transform_0, window_bounds = array<i64: 8, 13>}, {pipeline_mode = #tpu.pipeline_mode<synchronous>, transform_indices = @transform_1, window_bounds = array<i64: 13, 26>}, {pipeline_mode = #tpu.pipeline_mode<synchronous>, transform_indices = @transform_2, window_bounds = array<i64: 1, 26>}, {pipeline_mode = #tpu.pipeline_mode<synchronous>, transform_indices = @transform_3, window_bounds = array<i64: 26, 13>}, {pipeline_mode = #tpu.pipeline_mode<synchronous>, transform_indices = @transform_4, window_bounds = array<i64: 1, 13>}, {transform_indices = @transform_5, window_bounds = array<i64: 8, 13>}]} {
    %c0 = arith.constant 0 : index
    %c0_0 = arith.constant 0 : index
    %0 = vector.load %arg1[%c0, %c0_0] : memref<8x13xf32, #tpu.memory_space<vmem>>, vector<8x13xf32>
    %c0_1 = arith.constant 0 : index
    %c0_2 = arith.constant 0 : index
    %1 = vector.load %arg2[%c0_1, %c0_2] : memref<13x26xf32, #tpu.memory_space<vmem>>, vector<13x26xf32>
    %c0_3 = arith.constant 0 : index
    %c0_4 = arith.constant 0 : index
    %2 = vector.load %arg4[%c0_3, %c0_4] : memref<26x13xf32, #tpu.memory_space<vmem>>, vector<26x13xf32>
    %cst = arith.constant dense<0.000000e+00> : vector<8x26xf32>
    %3 = tpu.matmul %0, %1, %cst {dimension_numbers = #tpu.dot_dimension_numbers<[1], [0], [0], [1], [0, 0, 1, 1], [], []>} : vector<8x13xf32>, vector<13x26xf32>, vector<8x26xf32> -> vector<8x26xf32>
    %c0_5 = arith.constant 0 : index
    %c0_6 = arith.constant 0 : index
    %4 = vector.load %arg3[%c0_5, %c0_6] : memref<1x26xf32, #tpu.memory_space<vmem>>, vector<1x26xf32>
    %5 = vector.broadcast %4 : vector<1x26xf32> to vector<8x26xf32>
    %6 = arith.addf %3, %5 : vector<8x26xf32>
    %cst_7 = arith.constant 0.000000e+00 : f32
    %7 = vector.broadcast %cst_7 : f32 to vector<8x26xf32>
    %8 = arith.maximumf %6, %7 : vector<8x26xf32>
    %cst_8 = arith.constant dense<0.000000e+00> : vector<8x13xf32>
    %9 = tpu.matmul %8, %2, %cst_8 {dimension_numbers = #tpu.dot_dimension_numbers<[1], [0], [0], [1], [0, 0, 1, 1], [], []>} : vector<8x26xf32>, vector<26x13xf32>, vector<8x13xf32> -> vector<8x13xf32>
    %c0_9 = arith.constant 0 : index
    %c0_10 = arith.constant 0 : index
    %10 = vector.load %arg5[%c0_9, %c0_10] : memref<1x13xf32, #tpu.memory_space<vmem>>, vector<1x13xf32>
    %11 = vector.broadcast %10 : vector<1x13xf32> to vector<8x13xf32>
    %12 = arith.addf %9, %11 : vector<8x13xf32>
    %13 = math.tanh %12 : vector<8x13xf32>
    %c0_11 = arith.constant 0 : index
    %c0_12 = arith.constant 0 : index
    %14 = vector.load %arg6[%c0_11, %c0_12] : memref<8x13xf32, #tpu.memory_space<vmem>>, vector<8x13xf32>
    tpu.vector_store %arg6[%c0_11, %c0_12], %13 {strides = array<i32>} : memref<8x13xf32, #tpu.memory_space<vmem>>, vector<8x13xf32>,
    return
  }
  func.func @transform_0(%arg0: i32) -> (i32, i32) {
    %c0_i32 = arith.constant 0 : i32
    %c0_i32_0 = arith.constant 0 : i32
    return %arg0, %c0_i32 : i32, i32
  }
  func.func @transform_1(%arg0: i32) -> (i32, i32) {
    %c0_i32 = arith.constant 0 : i32
    %c0_i32_0 = arith.constant 0 : i32
    %c0_i32_1 = arith.constant 0 : i32
    return %c0_i32, %c0_i32_0 : i32, i32
  }
  func.func @transform_2(%arg0: i32) -> (i32, i32) {
    %c0_i32 = arith.constant 0 : i32
    %c0_i32_0 = arith.constant 0 : i32
    %c0_i32_1 = arith.constant 0 : i32
    return %c0_i32, %c0_i32_0 : i32, i32
  }
  func.func @transform_3(%arg0: i32) -> (i32, i32) {
    %c0_i32 = arith.constant 0 : i32
    %c0_i32_0 = arith.constant 0 : i32
    %c0_i32_1 = arith.constant 0 : i32
    return %c0_i32, %c0_i32_0 : i32, i32
  }
  func.func @transform_4(%arg0: i32) -> (i32, i32) {
    %c0_i32 = arith.constant 0 : i32
    %c0_i32_0 = arith.constant 0 : i32
    %c0_i32_1 = arith.constant 0 : i32
    return %c0_i32, %c0_i32_0 : i32, i32
  }
  func.func @transform_5(%arg0: i32) -> (i32, i32) {
    %c0_i32 = arith.constant 0 : i32
    %c0_i32_0 = arith.constant 0 : i32
    return %arg0, %c0_i32 : i32, i32
  }
}

</mosaic_0001>

<bundles_post_ra>
// kernel: testnet_forward.1
= control target key start
LH: loop header
LB: loop body
LE: loop exit
PB: predicated region body
PF: predicated region fallthrough
CT: control target
= control target key end

     0   :  { %vm39_vm0 = vcmask 1044480   ;;  %v274_v1 = vmov 0.0   ;;  %vm275_vm1 = vmmov 0   ;;  %vm125_vm2 = vcmask 1041408   ;;  %s339_s0 = inlined_call_operand.vmem [shape: f32[8,13], index: 0, kind: input, shape index: {}]   ;;  %s340_s1 = inlined_call_operand.vmem [shape: f32[13,26], index: 1, kind: input, shape index: {}]   ;;  %s341_s2 = inlined_call_operand.vmem [shape: f32[1,26], index: 2, kind: input, shape index: {}]   ;;  %s342_s3 = inlined_call_operand.vmem [shape: f32[26,13], index: 3, kind: input, shape index: {}]   ;;  %s343_s4 = inlined_call_operand.vmem [shape: f32[1,13], index: 4, kind: input, shape index: {}]   ;;  %s344_s5 = inlined_call_operand.hbm [shape: f32[8,13], index: 5, kind: output, shape index: {}]  }
   0x1   :  { %v23_v0 = vld [vmem:[%s340_s1 + $0x8] sm:$0x1f]  ;;  %229 = vmatprep.subr.mxu0 %v274_v1  ;;  %v22_v2 = vld [vmem:[%s340_s1] sm:$0xff]  ;;  %233 = vmatprep.mubr.msk.f32.mxu0 %vm275_vm1, %v274_v1  ;;  %v27_v3 = vld [vmem:[%s342_s3 + $0x18] sm:$0x3]  ;;  %vm35_vm3 = vcmask 105472  }
   0x2   :  { %230 = vmatpush3.msk.msra.mxu0 %vm39_vm0, %v23_v0  ;;  %v21_v4 = vld [vmem:[%s339_s0] sm:$0xff]  ;;  %236 = vmatprep.subr.mxu1 %v274_v1 }
   0x3   :  { %10 = vsyncpa [#allocation3], 0  ;;  %231 = vmatprep.subr.mxu0 %v274_v1  ;;  %237 = vmatpush3.msk.msra.mxu1 %vm125_vm2, %v27_v3  ;;  %v26_v5 = vld [vmem:[%s342_s3 + $0x10] sm:$0xff]  ;;  %v25_v6 = vld [vmem:[%s342_s3 + $0x8] sm:$0xff]  ;;  %vm121_vm4 = vcmask 211968  }
   0x4   :  { %232 = vmatpush3.msra.mxu0 %v22_v2  ;;  %238 = vmatprep.subr.mxu1 %v274_v1  ;;  %v24_v7 = vld [vmem:[%s342_s3] sm:$0xff]  ;;  %s276_s3 = smov [#allocation2]  }
   0x5   :  { %234 = vmatmul.mubr.msk.f32.vlgmr.msra.gmra.mxu0 %vm35_vm3, %v21_v4  ;;  %244 = vmatprep.mubr.msk.f32.mxu1 %vm275_vm1, %v274_v1  ;;  %v215_v8 = vld [vmem:[%s341_s2] ss:$0 sm:$0xff]  ;;  %s207_s9 = sshll.u32 %s276_s3, 4  ;;  %s208_s9 = int_to_ptr.vmem [resolvable:$true] %s207_s9 }
   0x6   :  { %239 = vmatpush3.msra.mxu1 %v26_v5  ;;  %v218_v13 = vld [vmem:[%s343_s4] ss:$0 sm:$0xff]  ;;  %s252_s2 = scalar_lea.vmem %s208_s9, 128  ;;  %p257_p1 = scmp.lt.s32.totalorder %s208_s9, %s208_s9 }
   0x7   :  { %240 = vmatprep.subr.mxu1 %v274_v1  ;;  %p253_p0 = scmp.ne.s32.totalorder %s208_s9, %s252_s2  ;;  %p258_p2 = scmp.lt.s32.totalorder %s252_s2, %s252_s2 }
   0x8   :  { %241 = vmatpush3.msra.mxu1 %v25_v6 }
   0x9   :  { %242 = vmatprep.subr.mxu1 %v274_v1  ;;  %p259_p3 = por %p258_p2, %p257_p1 }
   0xa   :  { %243 = vmatpush3.msra.mxu1 %v24_v7 }
   0xb   :  { %p260_p4 = pnand %p259_p3, %p253_p0 }
  0xc5   :  { %v109_v9 = vpop.f32.mrf.mxu0 }
  0xc6   :  { %v110_v10 = vadd.f32 %v215_v8, %v109_v9 }
  0xc7   :  { %v235_v11 = vpop.f32.mrf.mxu0 }
  0xc8   :  { %v113_v12 = vmax.f32 %v110_v10, 0.0 }
  0xca   :  { %245 = vmatmul.mubr.msk.f32.vlgmr.msra.gmra.mxu1 %vm121_vm4, %v113_v12 }
 0x18a   :  { %v195_v14 = vpop.f32.mrf.mxu1 }
 0x18b   :  { %v196_v15 = vadd.f32 %v218_v13, %v195_v14 }
 0x18c   :  { %v246_v16 = vpop.f32.mrf.mxu1 }
 0x18d   :  { %250 = vtanh.f32 %v196_v15 }
 0x19a   :  { %v251_v17 = vpop.eup %250 }
 0x19b   :  { %200 = vst.msk [vmem:[#allocation2] sm:$0xff] %vm35_vm3, %v251_v17 }
 0x19c   :  { %263 = shalt.err (!%p260_p4)
}
 0x19d   :  { %210 = dma.vmem_to_hbm [thread:$0]  %s208_s9, 128, %s344_s5, [#allocation3]  }
 0x19e   :  { %272 = dma.done.wait [#allocation3], 128  }
 0x19f   :  { %273 = vsyncadd [#allocation3], 4294967168 }
 0x1a0   :  { %214 = vsyncpa [#allocation3], 1 }

</bundles_post_ra>
